<compile_context>
chip_gen: v7x
topology: tpu7x:2x2x1
jax: 0.10.0
libtpu: 0.0.40
codegen_flags: <defaults>
</compile_context>

<pallas_src>
import functools
import math

import jax
import jax.numpy as jnp
from jax.experimental import pallas as pl
from jax.experimental.pallas import tpu as pltpu


# ----------------------------- small helpers -----------------------------

def _round_up(x, m):
    return ((x + m - 1) // m) * m


def _pad2d(x, mp, np_):
    m, n = x.shape
    if m == mp and n == np_:
        return x
    return jnp.pad(x, ((0, mp - m), (0, np_ - n)))


def _pick_tile(dp, candidates):
    for c in candidates:
        if dp % c == 0:
            return c
    return dp


# ----------------------------- tiled bf16 matmul -----------------------------

def _mm_kernel(a_ref, b_ref, o_ref, acc_ref):
    @pl.when(pl.program_id(2) == 0)
    def _init():
        acc_ref[...] = jnp.zeros_like(acc_ref)

    acc_ref[...] += jnp.dot(a_ref[...], b_ref[...],
                            preferred_element_type=jnp.float32)

    @pl.when(pl.program_id(2) == pl.num_programs(2) - 1)
    def _done():
        o_ref[...] = acc_ref[...]


def _mm_bias_kernel(a_ref, b_ref, bias_ref, o_ref, acc_ref):
    @pl.when(pl.program_id(2) == 0)
    def _init():
        acc_ref[...] = jnp.zeros_like(acc_ref)

    acc_ref[...] += jnp.dot(a_ref[...], b_ref[...],
                            preferred_element_type=jnp.float32)

    @pl.when(pl.program_id(2) == pl.num_programs(2) - 1)
    def _done():
        o_ref[...] = acc_ref[...] + bias_ref[...]


def pallas_matmul(a, b, bias=None):
    """C = A @ B (+ bias).  bf16 MXU operands, fp32 accumulation.  A:(M,K) B:(K,N)."""
    M, K = a.shape
    K2, N = b.shape
    assert K == K2

    Mp = _round_up(M, 8)
    Kp = _round_up(K, 128)
    Np = _round_up(N, 128)

    tm = 256 if Mp >= 256 else Mp
    Mp = _round_up(Mp, tm)
    tk = _pick_tile(Kp, (512, 256, 128))
    tn = _pick_tile(Np, (256, 128))

    a_p = _pad2d(a.astype(jnp.bfloat16), Mp, Kp)
    b_p = _pad2d(b.astype(jnp.bfloat16), Kp, Np)

    grid = (Mp // tm, Np // tn, Kp // tk)
    in_specs = [pl.BlockSpec((tm, tk), lambda i, j, k: (i, k)),
                pl.BlockSpec((tk, tn), lambda i, j, k: (k, j))]
    args = [a_p, b_p]
    if bias is not None:
        bias_p = _pad2d(bias.reshape(1, N).astype(jnp.float32), 1, Np)
        in_specs.append(pl.BlockSpec((1, tn), lambda i, j, k: (0, j)))
        args.append(bias_p)
        kern = _mm_bias_kernel
    else:
        kern = _mm_kernel

    out = pl.pallas_call(
        kern,
        out_shape=jax.ShapeDtypeStruct((Mp, Np), jnp.float32),
        grid=grid,
        in_specs=in_specs,
        out_specs=pl.BlockSpec((tm, tn), lambda i, j, k: (i, j)),
        scratch_shapes=[pltpu.VMEM((tm, tn), jnp.float32)],
        compiler_params=pltpu.CompilerParams(
            dimension_semantics=("parallel", "parallel", "arbitrary")),
    )(*args)
    return out[:M, :N]


# ----------------------------- two-pass BatchNorm -----------------------------

def _bn_stats_kernel(x_ref, sum_ref, sq_ref):
    @pl.when(pl.program_id(0) == 0)
    def _init():
        sum_ref[...] = jnp.zeros_like(sum_ref)
        sq_ref[...] = jnp.zeros_like(sq_ref)

    x = x_ref[...]
    sum_ref[...] += jnp.sum(x, axis=0, keepdims=True)
    sq_ref[...] += jnp.sum(x * x, axis=0, keepdims=True)


def _bn_apply_kernel(x_ref, sum_ref, sq_ref, g_ref, b_ref, o_ref, *,
                     inv_count, eps, relu):
    mean = sum_ref[...] * inv_count
    var = sq_ref[...] * inv_count - mean * mean
    scale = g_ref[...] * jax.lax.rsqrt(var + eps)
    shift = b_ref[...] - mean * scale
    y = x_ref[...] * scale + shift
    if relu:
        y = jnp.maximum(y, 0.0)
    o_ref[...] = y


def _bn_apply_res_kernel(x_ref, res_ref, sum_ref, sq_ref, g_ref, b_ref, o_ref, *,
                         inv_count, eps, relu):
    mean = sum_ref[...] * inv_count
    var = sq_ref[...] * inv_count - mean * mean
    scale = g_ref[...] * jax.lax.rsqrt(var + eps)
    shift = b_ref[...] - mean * scale
    y = x_ref[...] * scale + shift + res_ref[...]   # fused residual add
    if relu:
        y = jnp.maximum(y, 0.0)
    o_ref[...] = y


def pallas_batchnorm(x, gamma, beta, *, relu, residual=None, eps=1e-5):
    """BatchNorm over rows (batch stats) per channel; x:(M,C).  Optional fused
    residual add and ReLU in the apply pass."""
    M, C = x.shape
    Cp = _round_up(C, 128)
    Mp = _round_up(M, 8)
    tm = 256 if Mp >= 256 else Mp
    Mp = _round_up(Mp, tm)

    x_p = _pad2d(x.astype(jnp.float32), Mp, Cp)
    g_p = _pad2d(gamma.reshape(1, C).astype(jnp.float32), 1, Cp)
    b_p = _pad2d(beta.reshape(1, C).astype(jnp.float32), 1, Cp)

    # pass 1: per-channel sum / sum-of-squares, accumulated across the M grid
    s, sq = pl.pallas_call(
        _bn_stats_kernel,
        out_shape=(jax.ShapeDtypeStruct((1, Cp), jnp.float32),
                   jax.ShapeDtypeStruct((1, Cp), jnp.float32)),
        grid=(Mp // tm,),
        in_specs=[pl.BlockSpec((tm, Cp), lambda i: (i, 0))],
        out_specs=(pl.BlockSpec((1, Cp), lambda i: (0, 0)),
                   pl.BlockSpec((1, Cp), lambda i: (0, 0))),
        compiler_params=pltpu.CompilerParams(
            dimension_semantics=("arbitrary",)),
    )(x_p)

    # pass 2: scale/shift (+ residual) (+ ReLU), tiled over rows
    inv_count = 1.0 / float(M)
    if residual is not None:
        res_p = _pad2d(residual.astype(jnp.float32), Mp, Cp)
        kern = functools.partial(_bn_apply_res_kernel,
                                 inv_count=inv_count, eps=eps, relu=relu)
        args = [x_p, res_p, s, sq, g_p, b_p]
        in_specs = ([pl.BlockSpec((tm, Cp), lambda i: (i, 0)),
                     pl.BlockSpec((tm, Cp), lambda i: (i, 0))]
                    + [pl.BlockSpec((1, Cp), lambda i: (0, 0))] * 4)
    else:
        kern = functools.partial(_bn_apply_kernel,
                                 inv_count=inv_count, eps=eps, relu=relu)
        args = [x_p, s, sq, g_p, b_p]
        in_specs = ([pl.BlockSpec((tm, Cp), lambda i: (i, 0))]
                    + [pl.BlockSpec((1, Cp), lambda i: (0, 0))] * 4)

    y = pl.pallas_call(
        kern,
        out_shape=jax.ShapeDtypeStruct((Mp, Cp), jnp.float32),
        grid=(Mp // tm,),
        in_specs=in_specs,
        out_specs=pl.BlockSpec((tm, Cp), lambda i: (i, 0)),
        compiler_params=pltpu.CompilerParams(
            dimension_semantics=("parallel",)),
    )(*args)
    return y[:M, :C]


# ----------------------------- global average pool -----------------------------

def _gap_kernel(x_ref, o_ref, *, inv_hw):
    o_ref[...] = jnp.sum(x_ref[...], axis=1, keepdims=True) * inv_hw


def pallas_global_avg_pool(x):
    """AdaptiveAvgPool2d(1): x:(N,H,W,C) -> (N,C) via a per-sample VPU reduction."""
    N, H, W, C = x.shape
    HW = H * W
    HWp = _round_up(HW, 8)
    Cp = _round_up(C, 128)
    xr = x.reshape(N, HW, C).astype(jnp.float32)
    xr = jnp.pad(xr, ((0, 0), (0, HWp - HW), (0, Cp - C)))
    out = pl.pallas_call(
        functools.partial(_gap_kernel, inv_hw=1.0 / float(HW)),
        out_shape=jax.ShapeDtypeStruct((N, 1, Cp), jnp.float32),
        grid=(N,),
        in_specs=[pl.BlockSpec((1, HWp, Cp), lambda n: (n, 0, 0))],
        out_specs=pl.BlockSpec((1, 1, Cp), lambda n: (n, 0, 0)),
        compiler_params=pltpu.CompilerParams(
            dimension_semantics=("parallel",)),
    )(xr)
    return out.reshape(N, Cp)[:, :C]


# ----------------------------- L2 normalize -----------------------------

def _l2norm_kernel(x_ref, o_ref):
    x = x_ref[...]
    nrm = jnp.sqrt(jnp.sum(x * x, axis=-1, keepdims=True))
    o_ref[...] = x / jnp.maximum(nrm, 1e-12)   # F.normalize(dim=-1), eps=1e-12


def pallas_l2norm(x):
    M, C = x.shape
    Mp = _round_up(M, 8)
    Cp = _round_up(C, 128)
    tm = 256 if Mp >= 256 else Mp
    Mp = _round_up(Mp, tm)
    x_p = _pad2d(x.astype(jnp.float32), Mp, Cp)
    y = pl.pallas_call(
        _l2norm_kernel,
        out_shape=jax.ShapeDtypeStruct((Mp, Cp), jnp.float32),
        grid=(Mp // tm,),
        in_specs=[pl.BlockSpec((tm, Cp), lambda i: (i, 0))],
        out_specs=pl.BlockSpec((tm, Cp), lambda i: (i, 0)),
        compiler_params=pltpu.CompilerParams(
            dimension_semantics=("parallel",)),
    )(x_p)
    return y[:M, :C]


# ----------------------------- conv / model glue -----------------------------

def im2col(x, kh, kw, stride, pad):
    """x:(N,H,W,C) (bf16) -> (N*OH*OW, kh*kw*C) patch matrix (plain-JAX glue)."""
    # TODO(synk): fold the kh*kw patch extraction into the matmul K grid axis
    # (in-kernel window DMA) to avoid materializing the 9x patch matrix in HBM.
    N, H, W, C = x.shape
    xp = jnp.pad(x, ((0, 0), (pad, pad), (pad, pad), (0, 0)))
    OH = (H + 2 * pad - kh) // stride + 1
    OW = (W + 2 * pad - kw) // stride + 1
    cols = []
    for i in range(kh):
        for j in range(kw):
            cols.append(xp[:, i:i + stride * OH:stride, j:j + stride * OW:stride, :])
    patches = jnp.stack(cols, axis=3)                    # (N,OH,OW,kh*kw,C)
    return patches.reshape(N * OH * OW, kh * kw * C), OH, OW


def conv_bn(x, w, gamma, beta, *, stride, pad, relu, residual=None):
    """Conv2d(bias=False) + BatchNorm2d (+fused residual add) (+ReLU).
    x:(N,H,W,IC) fp32, w:(OC,IC,KH,KW) PyTorch layout."""
    N, H, W, IC = x.shape
    OC, _, KH, KW = w.shape
    cols, OH, OW = im2col(x.astype(jnp.bfloat16), KH, KW, stride, pad)
    wm = jnp.transpose(w, (2, 3, 1, 0)).reshape(KH * KW * IC, OC).astype(jnp.bfloat16)
    y = pallas_matmul(cols, wm)                          # MXU hot path (bf16 x bf16 -> fp32)
    res2d = None if residual is None else residual.reshape(N * OH * OW, OC)
    y = pallas_batchnorm(y, gamma, beta, relu=relu, residual=res2d)
    return y.reshape(N, OH, OW, OC)


def basic_block(x, p):
    stride = p['stride']
    out = conv_bn(x, p['conv1_w'], p['bn1_g'], p['bn1_b'],
                  stride=stride, pad=1, relu=True)
    if 'down_w' in p:
        identity = conv_bn(x, p['down_w'], p['down_g'], p['down_b'],
                           stride=stride, pad=0, relu=False)
    else:
        identity = x
    # conv2 + BN2 + residual-add + ReLU, with add/ReLU fused into the BN apply kernel
    out = conv_bn(out, p['conv2_w'], p['bn2_g'], p['bn2_b'],
                  stride=1, pad=1, relu=True, residual=identity)
    return out


def init_params(key, hidden_dim, prej_dim):
    keys = iter(jax.random.split(key, 64))

    def conv_w(oc, ic, k):
        fan_in = ic * k * k
        return jax.random.normal(next(keys), (oc, ic, k, k), jnp.float32) / math.sqrt(fan_in)

    def lin_w(out_f, in_f):
        return jax.random.normal(next(keys), (out_f, in_f), jnp.float32) / math.sqrt(in_f)

    def block(ic, oc, stride):
        p = {
            'stride': stride,
            'conv1_w': conv_w(oc, ic, 3),
            'bn1_g': jnp.ones((oc,), jnp.float32), 'bn1_b': jnp.zeros((oc,), jnp.float32),
            'conv2_w': conv_w(oc, oc, 3),
            # zero_init_residual=True -> second BN gamma initialized to zero
            'bn2_g': jnp.zeros((oc,), jnp.float32), 'bn2_b': jnp.zeros((oc,), jnp.float32),
        }
        if stride != 1 or ic != oc:
            p['down_w'] = conv_w(oc, ic, 1)
            p['down_g'] = jnp.ones((oc,), jnp.float32)
            p['down_b'] = jnp.zeros((oc,), jnp.float32)
        return p

    params = {
        # modified stem: Conv2d(3, 64, kernel_size=3, stride=1, padding=2, bias=False)
        'conv1_w': conv_w(64, 3, 3),
        'bn1_g': jnp.ones((64,), jnp.float32), 'bn1_b': jnp.zeros((64,), jnp.float32),
    }
    layers, in_c = [], 64
    for out_c, stride in [(64, 1), (128, 2), (256, 2), (512, 2)]:
        layers.append([block(in_c, out_c, stride), block(out_c, out_c, 1)])
        in_c = out_c
    params['layers'] = layers
    # projector
    params['proj_w1'] = lin_w(hidden_dim, 512)
    params['proj_bn1_g'] = jnp.ones((hidden_dim,), jnp.float32)
    params['proj_bn1_b'] = jnp.zeros((hidden_dim,), jnp.float32)
    params['proj_w2'] = lin_w(hidden_dim, hidden_dim)
    params['proj_bn2_g'] = jnp.ones((hidden_dim,), jnp.float32)
    params['proj_bn2_b'] = jnp.zeros((hidden_dim,), jnp.float32)
    params['proj_w3'] = lin_w(prej_dim, hidden_dim)
    params['proj_b3'] = jnp.zeros((prej_dim,), jnp.float32)
    return params


def encoder_forward(params, x_nchw):
    # NCHW (PyTorch) -> NHWC (kernel layout)
    x = jnp.transpose(x_nchw, (0, 2, 3, 1)).astype(jnp.float32)

    # ---- backbone (ResNet-18, maxpool = Identity, fc = Identity) ----
    x = conv_bn(x, params['conv1_w'], params['bn1_g'], params['bn1_b'],
                stride=1, pad=2, relu=True)
    for blocks in params['layers']:
        for bp in blocks:
            x = basic_block(x, bp)

    # global average pool (AdaptiveAvgPool2d(1)) via a VPU reduction kernel
    h = pallas_global_avg_pool(x)                        # (N, 512)

    # ---- projector ----
    z = pallas_matmul(h, params['proj_w1'].T)
    z = pallas_batchnorm(z, params['proj_bn1_g'], params['proj_bn1_b'], relu=True)
    z = pallas_matmul(z, params['proj_w2'].T)
    z = pallas_batchnorm(z, params['proj_bn2_g'], params['proj_bn2_b'], relu=True)
    z = pallas_matmul(z, params['proj_w3'].T, bias=params['proj_b3'])

    return h, pallas_l2norm(h), z, pallas_l2norm(z)


# TODO(synk): calc_contrastive_loss / calc_wasserstein_loss (torch.linalg.eig) are not
# part of forward() and are not implemented here.

if __name__ == "__main__":
    key = jax.random.PRNGKey(0)
    k_param, k_x = jax.random.split(key)
    hidden_dim, prej_dim = 32, 16
    params = init_params(k_param, hidden_dim, prej_dim)

    x = jax.random.normal(k_x, (2, 3, 16, 16), jnp.float32)  # NCHW, like PyTorch

    h, h_norm, z, z_norm = encoder_forward(params, x)
    jax.block_until_ready((h, h_norm, z, z_norm))

    assert h.shape == (2, 512) and h_norm.shape == (2, 512)
    assert z.shape == (2, prej_dim) and z_norm.shape == (2, prej_dim)
    print("KERNEL_OK")
</pallas_src>

<mosaic_0001>
module attributes {stable_mosaic.version = 11 : i64} {
  func.func @_mm_kernel(%arg0: i32, %arg1: i32, %arg2: i32, %arg3: memref<256x128xbf16, #tpu.memory_space<vmem>>, %arg4: memref<128x128xbf16, #tpu.memory_space<vmem>>, %arg5: memref<256x128xf32, #tpu.memory_space<vmem>>, %arg6: memref<256x128xf32, #tpu.memory_space<vmem>>) attributes {dimension_semantics = [#tpu.dimension_semantics<parallel>, #tpu.dimension_semantics<parallel>, #tpu.dimension_semantics<arbitrary>], iteration_bounds = array<i64: 3, 1, 1>, scalar_prefetch = 0 : i64, scratch_operands = 1 : i64, tpu.core_type = #tpu.core_type<tc>, window_params = [{transform_indices = @transform_0, window_bounds = array<i64: 256, 128>}, {transform_indices = @transform_1, window_bounds = array<i64: 128, 128>}, {transform_indices = @transform_2, window_bounds = array<i64: 256, 128>}]} {
    %c0_i32 = arith.constant 0 : i32
    %0 = arith.cmpi eq, %arg2, %c0_i32 : i32
    %1 = arith.extui %0 : i1 to i32
    %c0_i32_0 = arith.constant 0 : i32
    %2 = arith.cmpi ne, %1, %c0_i32_0 : i32
    scf.if %2 {
      %cst_10 = arith.constant 0.000000e+00 : f32
      %12 = vector.broadcast %cst_10 : f32 to vector<256x128xf32>
      %c0_11 = arith.constant 0 : index
      %c0_12 = arith.constant 0 : index
      %13 = vector.load %arg6[%c0_11, %c0_12] : memref<256x128xf32, #tpu.memory_space<vmem>>, vector<256x128xf32>
      tpu.vector_store %arg6[%c0_11, %c0_12], %12 {strides = array<i32>} : memref<256x128xf32, #tpu.memory_space<vmem>>, vector<256x128xf32>,
    } else {
    }
    %c0 = arith.constant 0 : index
    %c0_1 = arith.constant 0 : index
    %3 = vector.load %arg6[%c0, %c0_1] : memref<256x128xf32, #tpu.memory_space<vmem>>, vector<256x128xf32>
    %c0_2 = arith.constant 0 : index
    %c0_3 = arith.constant 0 : index
    %4 = vector.load %arg3[%c0_2, %c0_3] : memref<256x128xbf16, #tpu.memory_space<vmem>>, vector<256x128xbf16>
    %c0_4 = arith.constant 0 : index
    %c0_5 = arith.constant 0 : index
    %5 = vector.load %arg4[%c0_4, %c0_5] : memref<128x128xbf16, #tpu.memory_space<vmem>>, vector<128x128xbf16>
    %cst = arith.constant dense<0.000000e+00> : vector<256x128xf32>
    %6 = tpu.matmul %4, %5, %cst {dimension_numbers = #tpu.dot_dimension_numbers<[1], [0], [0], [1], [0, 0, 1, 1], [], []>} : vector<256x128xbf16>, vector<128x128xbf16>, vector<256x128xf32> -> vector<256x128xf32>
    %7 = arith.addf %3, %6 : vector<256x128xf32>
    %c0_6 = arith.constant 0 : index
    %c0_7 = arith.constant 0 : index
    %8 = vector.load %arg6[%c0_6, %c0_7] : memref<256x128xf32, #tpu.memory_space<vmem>>, vector<256x128xf32>
    tpu.vector_store %arg6[%c0_6, %c0_7], %7 {strides = array<i32>} : memref<256x128xf32, #tpu.memory_space<vmem>>, vector<256x128xf32>,
    %c0_i32_8 = arith.constant 0 : i32
    %9 = arith.cmpi eq, %arg2, %c0_i32_8 : i32
    %10 = arith.extui %9 : i1 to i32
    %c0_i32_9 = arith.constant 0 : i32
    %11 = arith.cmpi ne, %10, %c0_i32_9 : i32
    scf.if %11 {
      %c0_10 = arith.constant 0 : index
      %c0_11 = arith.constant 0 : index
      %12 = vector.load %arg6[%c0_10, %c0_11] : memref<256x128xf32, #tpu.memory_space<vmem>>, vector<256x128xf32>
      %c0_12 = arith.constant 0 : index
      %c0_13 = arith.constant 0 : index
      %13 = vector.load %arg5[%c0_12, %c0_13] : memref<256x128xf32, #tpu.memory_space<vmem>>, vector<256x128xf32>
      tpu.vector_store %arg5[%c0_12, %c0_13], %12 {strides = array<i32>} : memref<256x128xf32, #tpu.memory_space<vmem>>, vector<256x128xf32>,
    } else {
    }
    return
  }
  func.func @transform_0(%arg0: i32, %arg1: i32, %arg2: i32) -> (i32, i32) {
    %c0_i32 = arith.constant 0 : i32
    return %arg0, %arg2 : i32, i32
  }
  func.func @transform_1(%arg0: i32, %arg1: i32, %arg2: i32) -> (i32, i32) {
    %c0_i32 = arith.constant 0 : i32
    return %arg2, %arg1 : i32, i32
  }
  func.func @transform_2(%arg0: i32, %arg1: i32, %arg2: i32) -> (i32, i32) {
    %c0_i32 = arith.constant 0 : i32
    return %arg0, %arg1 : i32, i32
  }
}

</mosaic_0001>

<bundles_post_ra>
// kernel: tpu_custom_call.1
= control target key start
LH: loop header
LB: loop body
LE: loop exit
PB: predicated region body
PF: predicated region fallthrough
CT: control target
= control target key end

     0   :  { %7 = vsyncpa [#allocation4], 0  ;;  %s1562_s0 = inlined_call_operand.hbm [shape: bf16[768,128], index: 0, kind: input, shape index: {}]   ;;  %s1563_s1 = inlined_call_operand.hbm [shape: bf16[128,128], index: 1, kind: input, shape index: {}]   ;;  %s1564_s2 = inlined_call_operand.hbm [shape: f32[768,128], index: 2, kind: output, shape index: {}]  }
   0x1   :  { %9 = vsyncpa [#allocation4 + $0x1], 0 }
   0x2   :  { %10 = vsyncpa [#allocation7], 0 }
   0x3   :  { %11 = vsyncpa [#allocation5], 0 }
   0x4   :  { %13 = vsyncpa [#allocation5 + $0x1], 0  ;;  %s1285_s9 = smov 0   ;;  %s1287_s10 = smov 0  }
   0x5   :  { %s1289_s11 = smov 0   ;;  %s1291_s12 = smov 0  }
   0x6   :  { %s1293_s13 = smov 0   ;;  %s1295_s14 = smov 0  }
   0x7 LB: > { %s885_s15 = sadd.s32 4294967295, %s1261_s14   ;;  %s886_s16 = sadd.s32 4294967294, %s1261_s14   ;;  %s1261_s14 = sphi %s1295_s14, %s19_s14   ;;  %s1257_s13 = sphi %s1293_s13, %s1587_s13   ;;  %s1253_s12 = sphi %s1291_s12, %s1586_s12   ;;  %s1249_s11 = sphi %s1289_s11, %s1585_s11   ;;  %s1245_s10 = sphi %s1287_s10, %s1584_s10   ;;  %s1241_s9 = sphi %s1285_s9, %s1583_s9  }
   0x8   : > { %p60_p0 = scmp.ne.s32.totalorder %s1245_s10, %s1241_s9  ;;  %p1319_p1 = scmp.eq.s32.totalorder %s885_s15, 0 }
   0x9   : > { %p1323_p2 = scmp.eq.s32.totalorder %s885_s15, 2  ;;  %p120_p3 = scmp.eq.s32.totalorder %s886_s16, 2 }
   0xa   : > { %s1569_s17 = scalar_select %p1319_p1, 1, 0 }
   0xb   : > { %s1570_s18 = scalar_select %p1323_p2, 1, 0 }
   0xc   : > { %p1329_p4 = por %p1319_p1, %p60_p0  ;;  %p887_p5 = scmp.ge.s32.totalorder %s1261_s14, 1 }
   0xd   : > { %p1334_p6 = por %p120_p3, %p60_p0  ;;  %p127_p7 = scmp.lt.s32.totalorder %s1261_s14, 4 }
   0xe   : > { %s1571_s19 = scalar_select %p1329_p4, 1, 0 }
   0xf   : > { %s1572_s20 = scalar_select %p1334_p6, 1, 0 }
  0x10   : > { %p1339_p8 = pnand %p887_p5, %p127_p7  ;;  %s1263_s22 = smov [#allocation6]  }
  0x11   : > { %s143_s23 = sshll.u32 %s1263_s22, 4  ;;  %s38_s25 = sadd.s32 1, %s1257_s13  ;;  %s144_s23 = int_to_ptr.vmem [resolvable:$true] %s143_s23 }
  0x12   : > { %s1573_s21 = scalar_select %p1339_p8, 1, 0 }
  0x13   : > { %p1024_p9 = pneg %p1339_p8  ;;  %s1117_s28 = scalar_lea.hbm %s1563_s1, 1024 }
  0x14   : > { %p1118_p11 = scmp.ne.s32.totalorder %s1563_s1, %s1117_s28  ;;  %p1124_p3 = scmp.lt.u32.totalorder %s1117_s28, %s1563_s1 }
  0x15   : > { %p1347_p10 = pnand %p1024_p9, %p1319_p1 }
  0x17   : > { %p1119_p12 = pneg %p1347_p10 }
  0x19   : > { %p1120_p13 = pnand %p1119_p12, %p1118_p11 }
  0x1b   : > { %p1121_p0 = pneg %p1120_p13 }
  0x1d   : > { %p1126_p5 = pnand %p1124_p3, %p1121_p0 }
  0x1f   : > { %1129 = shalt.err (!%p1126_p5)
}
  0x20   : > { %s1130_s5 = scalar_lea.vmem %s144_s23, 1024  ;;  %p1138_p1 = scmp.lt.s32.totalorder %s144_s23, %s144_s23 }
  0x21   : > { %p1131_p7 = scmp.ne.s32.totalorder %s144_s23, %s1130_s5  ;;  %p1139_p4 = scmp.lt.s32.totalorder %s1130_s5, %s1130_s5 }
  0x23   : > { %p1133_p9 = pnand %p1131_p7, %p1119_p12  ;;  %p1140_p8 = por %p1139_p4, %p1138_p1 }
  0x25   : > { %p1134_p6 = pneg %p1133_p9 }
  0x27   : > { %p1141_p2 = pnand %p1140_p8, %p1134_p6 }
  0x29   : > { %1144 = shalt.err (!%p1141_p2)
}
  0x2a   : > { %s1264_s6 = smov 64   ;;  %s1265_s7 = smov 4  }
  0x2b   : > { %1027 = dma.hbm_to_vmem [thread:$0]  (!%p1347_p10), %s1563_s1, 1024, %s144_s23, [#allocation7], %s1264_s6, %s1264_s6, %s1265_s7  }
  0x2c   : > { %p40_p1 = scmp.ge.s32.totalorder %s38_s25, 3  ;;  %s47_s16 = sadd.s32 1, %s1249_s11 }
  0x2d   : > { %p54_p2 = scmp.ne.s32.totalorder %s1249_s11, %s1245_s10  ;;  %p55_p4 = scmp.eq.s32.totalorder %s1261_s14, 0 }
  0x2e   : > { %s1589_s25 = smov (%p40_p1, %s38_s25), 0  ;;  %p1576_p8 = scmp.ne.s32.totalorder %s1570_s18, 0 }
  0x2f   : > { %p1377_p6 = por %p55_p4, %p54_p2  ;;  %s42_s26 = ssub.s32 %s1257_s13, %s1589_s25 }
  0x30   : > { %p1383_p11 = por %p1576_p8, %p54_p2  ;;  %p1037_p12 = scmp.lt.s32.totalorder %s1261_s14, 3 }
  0x31   : > { %p45_p10 = scmp.eq.s32.totalorder %s42_s26, 0  ;;  %s157_s23 = sand.u32 1, %s1249_s11  }
  0x32   : > { %s890_s27 = sshll.u32 %s157_s23, 7  ;;  %s926_s29 = sshll.u32 %s1257_s13, 11 }
  0x33   : > { %s1392_s28 = scalar_select %p45_p10, %s1249_s11, %s47_s16  }
  0x34   : > { %s1398_s4 = scalar_lea.hbm %s1562_s0, %s926_s29  ;;  %s161_s18 = scalar_lea.vmem [#allocation3], %s890_s27 }
  0x35   : > { %s169_s5 = sshll.u32 %s161_s18, 4  ;;  %p1404_p13 = pnand %p1037_p12, %p1377_p6  ;;  %s1400_s5 = int_to_ptr.vmem [resolvable:$true] %s169_s5 }
  0x36   : > { %s1408_s15 = scalar_lea.sflag [#allocation4], %s157_s23  ;;  %s1145_s16 = scalar_lea.hbm %s1398_s4, 2048 }
  0x37   : > { %p1146_p0 = scmp.ne.s32.totalorder %s1398_s4, %s1145_s16  ;;  %p1147_p3 = pneg %p1404_p13 }
  0x38   : > { %s1150_s22 = scalar_lea.hbm %s1562_s0, 6144  ;;  %p1151_p9 = scmp.lt.u32.totalorder %s1398_s4, %s1562_s0 }
  0x39   : > { %p1148_p5 = pnand %p1147_p3, %p1146_p0  ;;  %p1152_p1 = scmp.lt.u32.totalorder %s1150_s22, %s1145_s16 }
  0x3a   : > { %p1154_p4 = scmp.lt.u32.totalorder %s1145_s16, %s1398_s4 }
  0x3b   : > { %p1149_p7 = pneg %p1148_p5  ;;  %p1153_p2 = por %p1152_p1, %p1151_p9 }
  0x3d   : > { %p1155_p6 = por %p1154_p4, %p1153_p2 }
  0x3f   : > { %p1156_p8 = pnand %p1155_p6, %p1149_p7 }
  0x41   : > { %1159 = shalt.err (!%p1156_p8)
}
  0x42   : > { %s1160_s23 = scalar_lea.vmem %s1400_s5, 2048  ;;  %s1266_s3 = smov [#allocation3]  }
  0x43   : > { %p1161_p12 = scmp.ne.s32.totalorder %s1400_s5, %s1160_s23  ;;  %s1165_s18 = sshll.u32 %s1266_s3, 4  ;;  %s1166_s18 = int_to_ptr.vmem [resolvable:$false] %s1165_s18 }
  0x44   : > { %s1167_s26 = scalar_lea.vmem %s1166_s18, 4096  ;;  %p1168_p5 = scmp.lt.s32.totalorder %s1400_s5, %s1166_s18 }
  0x45   : > { %p1163_p10 = pnand %p1161_p12, %p1147_p3  ;;  %p1169_p9 = scmp.lt.s32.totalorder %s1167_s26, %s1160_s23 }
  0x47   : > { %p1164_p0 = pneg %p1163_p10  ;;  %p1170_p1 = por %p1169_p9, %p1168_p5 }
  0x49   : > { %p1171_p2 = pnand %p1170_p1, %p1164_p0 }
  0x4b   : > { %1174 = shalt.err (!%p1171_p2)
}
  0x4c   : > { %1031 = dma.hbm_to_vmem [thread:$0]  (!%p1404_p13), %s1398_s4, 2048, %s1400_s5, %s1408_s15, %s1264_s6, %s1264_s6, %s1265_s7  }
  0x4d   : > { %p1579_p3 = scmp.ne.s32.totalorder %s1573_s21, 0 }
  0x4e   : > { %s1442_s16 = sand.u32 (!%p1579_p3), 1, %s1245_s10   ;;  %p1580_p7 = scmp.ne.s32.totalorder (!%p1579_p3), %s1571_s19, 0 }
  0x4f   : > { %181 = sbr.rel (%p1579_p3) target bundleno = 377 (0x179), region = 28  ;;  %s894_s27 = sshll.u32 (!%p1579_p3), %s1442_s16, 7 }
  0x50   : > { %s184_s22 = scalar_lea.sflag (!%p1579_p3), [#allocation4], %s1442_s16  ;;  %s1446_s29 = scalar_lea.vmem (!%p1579_p3), [#allocation3], %s894_s27 }
  0x56   : > { %1228 = dma.done.wait (%p1580_p7), %s184_s22, 2048  }
  0x57   : > { %1230 = vsyncadd (%p1580_p7), %s184_s22, 4294965248  ;;  %p1581_p13 = scmp.ne.s32.totalorder %s1569_s17, 0 }
  0x59   : > { %1232 = dma.done.wait (%p1581_p13), [#allocation7], 1024  }
  0x5a   : > { %1234 = vsyncadd (%p1581_p13), [#allocation7], 4294966272  ;;  %v1093_v0 = vld [vmem:[#allocation6] sm:$0xff]   ;;  %v1094_v1 = vld [vmem:[#allocation6 + $0x8] sm:$0xff]   ;;  %s896_s17 = sshll.u32 %s1442_s16, 8  ;;  %s927_s21 = sshll.u32 %s1253_s12, 12 }
  0x5b   : > { %952 = vmatprep.subr.bf16.mxu0 %v1093_v0  ;;  %1000 = vmatprep.subr.bf16.mxu1 %v1093_v0  ;;  %v1095_v2 = vld [vmem:[#allocation6 + $0x10] sm:$0xff]   ;;  %v1096_v3 = vld [vmem:[#allocation6 + $0x18] sm:$0xff]   ;;  %v1101_v4 = vld [vmem:[%s1446_s29] sm:$0xff]   ;;  %s1473_s19 = scalar_lea.vmem [#allocation8], %s896_s17  ;;  %s1506_s5 = scalar_lea.hbm %s1564_s2, %s927_s21 }
  0x5c   : > { %953 = vmatpush3.bf16.msra.mxu0 %v1093_v0  ;;  %1008 = vmatpush3.bf16.msra.mxu1 %v1093_v0  ;;  %v1102_v5 = vld [vmem:[%s1446_s29 + $0x40] sm:$0xff]   ;;  %v1098_v7 = vld [vmem:[#allocation6 + $0x28] sm:$0xff]   ;;  %v1099_v8 = vld [vmem:[#allocation6 + $0x30] sm:$0xff]   ;;  %s783_s6 = sshll.u32 %s1473_s19, 4  ;;  %s769_s12 = scalar_lea.sflag [#allocation5], %s1442_s16  ;;  %s1508_s6 = int_to_ptr.vmem [resolvable:$true] %s783_s6 }
  0x5d   : > { %954 = vmatprep.subr.bf16.mxu0 %v1094_v1  ;;  %1001 = vmatprep.subr.bf16.mxu1 %v1094_v1  ;;  %v1097_v6 = vld [vmem:[#allocation6 + $0x20] sm:$0xff]   ;;  %v1100_v9 = vld [vmem:[#allocation6 + $0x38] sm:$0xff]   ;;  %v1103_v10 = vld [vmem:[%s1446_s29 + $0x8] sm:$0xff]   ;;  %s1175_s8 = scalar_lea.vmem %s1508_s6, 4096  ;;  %s1267_s15 = smov [#allocation8]  }
  0x5e   : > { %968 = vmatprep.mubr.bf16.mxu0 %v1101_v4  ;;  %984 = vmatprep.mubr.bf16.mxu1 %v1102_v5  ;;  %v1104_v11 = vld [vmem:[%s1446_s29 + $0x48] sm:$0xff]   ;;  %v1105_v12 = vld [vmem:[%s1446_s29 + $0x10] sm:$0xff]   ;;  %v1107_v14 = vld [vmem:[%s1446_s29 + $0x18] sm:$0xff]   ;;  %p1176_p4 = scmp.ne.s32.totalorder %s1508_s6, %s1175_s8  ;;  %s1179_s30 = sshll.u32 %s1267_s15, 4  ;;  %s1180_s30 = int_to_ptr.vmem [resolvable:$false] %s1179_s30 }
  0x5f   : > { %v1106_v13 = vld [vmem:[%s1446_s29 + $0x50] sm:$0xff]   ;;  %v1108_v15 = vld [vmem:[%s1446_s29 + $0x58] sm:$0xff]   ;;  %v1109_v16 = vld [vmem:[%s1446_s29 + $0x20] sm:$0xff]   ;;  %s1181_s23 = scalar_lea.vmem %s1180_s30, 8192  ;;  %p1182_p12 = scmp.lt.s32.totalorder %s1508_s6, %s1180_s30 }
  0x60   : > { %955 = vmatpush3.bf16.msra.mxu0 %v1094_v1  ;;  %1009 = vmatpush3.bf16.msra.mxu1 %v1094_v1  ;;  %v1110_v17 = vld [vmem:[%s1446_s29 + $0x60] sm:$0xff]   ;;  %v1111_v18 = vld [vmem:[%s1446_s29 + $0x28] sm:$0xff]   ;;  %v1113_v20 = vld [vmem:[%s1446_s29 + $0x30] sm:$0xff]   ;;  %p1177_p6 = pnand %p1176_p4, %p1383_p11  ;;  %p1183_p10 = scmp.lt.s32.totalorder %s1181_s23, %s1175_s8 }
  0x61   : > { %956 = vmatprep.subr.bf16.mxu0 %v1095_v2  ;;  %1002 = vmatprep.subr.bf16.mxu1 %v1095_v2  ;;  %v1112_v19 = vld [vmem:[%s1446_s29 + $0x68] sm:$0xff]   ;;  %v1114_v21 = vld [vmem:[%s1446_s29 + $0x70] sm:$0xff]   ;;  %v1115_v22 = vld [vmem:[%s1446_s29 + $0x38] sm:$0xff]  }
  0x62   : > { %v1116_v23 = vld [vmem:[%s1446_s29 + $0x78] sm:$0xff]   ;;  %p1178_p8 = pneg %p1177_p6  ;;  %p1184_p0 = por %p1183_p10, %p1182_p12 }
  0x64   : > { %957 = vmatpush3.bf16.msra.mxu0 %v1095_v2  ;;  %1010 = vmatpush3.bf16.msra.mxu1 %v1095_v2  ;;  %p1185_p5 = pnand %p1184_p0, %p1178_p8 }
  0x65   : > { %958 = vmatprep.subr.bf16.mxu0 %v1096_v3  ;;  %1003 = vmatprep.subr.bf16.mxu1 %v1096_v3 }
  0x68   : > { %959 = vmatpush3.bf16.msra.mxu0 %v1096_v3  ;;  %1011 = vmatpush3.bf16.msra.mxu1 %v1096_v3 }
  0x69   : > { %960 = vmatprep.subr.bf16.mxu0 %v1097_v6  ;;  %1004 = vmatprep.subr.bf16.mxu1 %v1097_v6 }
  0x6c   : > { %961 = vmatpush3.bf16.msra.mxu0 %v1097_v6  ;;  %1012 = vmatpush3.bf16.msra.mxu1 %v1097_v6 }
  0x6d   : > { %962 = vmatprep.subr.bf16.mxu0 %v1098_v7  ;;  %1005 = vmatprep.subr.bf16.mxu1 %v1098_v7 }
  0x70   : > { %963 = vmatpush3.bf16.msra.mxu0 %v1098_v7  ;;  %1013 = vmatpush3.bf16.msra.mxu1 %v1098_v7 }
  0x71   : > { %964 = vmatprep.subr.bf16.mxu0 %v1099_v8  ;;  %1006 = vmatprep.subr.bf16.mxu1 %v1099_v8 }
  0x74   : > { %965 = vmatpush3.bf16.msra.mxu0 %v1099_v8  ;;  %1014 = vmatpush3.bf16.msra.mxu1 %v1099_v8 }
  0x75   : > { %966 = vmatprep.subr.bf16.mxu0 %v1100_v9  ;;  %1007 = vmatprep.subr.bf16.mxu1 %v1100_v9 }
  0x78   : > { %967 = vmatpush3.bf16.msra.mxu0 %v1100_v9  ;;  %1015 = vmatpush3.bf16.msra.mxu1 %v1100_v9 }
  0x7b   : > { %969 = vmatmul.mubr.bf16.vlgmr.msra.gmra.mrb[0].mxu0 %v1103_v10  ;;  %985 = vmatmul.mubr.bf16.vlgmr.msra.gmra.mrb[0].mxu1 %v1104_v11 }
  0x7c   : > { %972 = vmatprep.mubr.bf16.mxu0 %v1105_v12  ;;  %988 = vmatprep.mubr.bf16.mxu1 %v1106_v13 }
  0x83   : > { %973 = vmatmul.mubr.bf16.gmra.mrb[4].mxu0 %v1107_v14  ;;  %989 = vmatmul.mubr.bf16.gmra.mrb[4].mxu1 %v1108_v15 }
  0x84   : > { %976 = vmatprep.mubr.bf16.mxu0 %v1109_v16  ;;  %992 = vmatprep.mubr.bf16.mxu1 %v1110_v17 }
  0x8b   : > { %977 = vmatmul.mubr.bf16.gmra.mrb[8].mxu0 %v1111_v18  ;;  %993 = vmatmul.mubr.bf16.gmra.mrb[8].mxu1 %v1112_v19 }
  0x8c   : > { %980 = vmatprep.mubr.bf16.mxu0 %v1113_v20  ;;  %996 = vmatprep.mubr.bf16.mxu1 %v1114_v21 }
  0x93   : > { %981 = vmatmul.mubr.bf16.gmra.mrb[12].mxu0 %v1115_v22  ;;  %997 = vmatmul.mubr.bf16.gmra.mrb[12].mxu1 %v1116_v23 }
 0x14e   : > { %v970_v24 = vpop.f32.mrb[0].mxu0  ;;  %v986_v25 = vpop.f32.mrb[0].mxu1 }
 0x14f   : > { %738 = vst [vmem:[%s1473_s19 + $0x10] sm:$0xff] %v970_v24  ;;  %754 = vst [vmem:[%s1473_s19 + $0x90] sm:$0xff] %v986_v25  ;;  %v510_v26 = vpop.f32.mrb[1].mxu0  ;;  %v574_v27 = vpop.f32.mrb[1].mxu1 }
 0x150   : > { %736 = vst [vmem:[%s1473_s19] sm:$0xff] %v510_v26  ;;  %752 = vst [vmem:[%s1473_s19 + $0x80] sm:$0xff] %v574_v27  ;;  %v971_v28 = vpop.f32.mrb[2].mxu0  ;;  %v987_v29 = vpop.f32.mrb[2].mxu1 }
 0x151   : > { %739 = vst [vmem:[%s1473_s19 + $0x18] sm:$0xff] %v971_v28  ;;  %755 = vst [vmem:[%s1473_s19 + $0x98] sm:$0xff] %v987_v29  ;;  %v513_v30 = vpop.f32.mrb[3].mxu0  ;;  %v577_v31 = vpop.f32.mrb[3].mxu1 }
 0x152   : > { %737 = vst [vmem:[%s1473_s19 + $0x8] sm:$0xff] %v513_v30  ;;  %753 = vst [vmem:[%s1473_s19 + $0x88] sm:$0xff] %v577_v31 }
 0x156   : > { %v974_v32 = vpop.f32.mrb[4].mxu0  ;;  %v990_v33 = vpop.f32.mrb[4].mxu1 }
 0x157   : > { %742 = vst [vmem:[%s1473_s19 + $0x30] sm:$0xff] %v974_v32  ;;  %758 = vst [vmem:[%s1473_s19 + $0xb0] sm:$0xff] %v990_v33  ;;  %v526_v34 = vpop.f32.mrb[5].mxu0  ;;  %v590_v35 = vpop.f32.mrb[5].mxu1 }
 0x158   : > { %740 = vst [vmem:[%s1473_s19 + $0x20] sm:$0xff] %v526_v34  ;;  %756 = vst [vmem:[%s1473_s19 + $0xa0] sm:$0xff] %v590_v35  ;;  %v975_v36 = vpop.f32.mrb[6].mxu0  ;;  %v991_v37 = vpop.f32.mrb[6].mxu1 }
 0x159   : > { %743 = vst [vmem:[%s1473_s19 + $0x38] sm:$0xff] %v975_v36  ;;  %759 = vst [vmem:[%s1473_s19 + $0xb8] sm:$0xff] %v991_v37  ;;  %v529_v38 = vpop.f32.mrb[7].mxu0  ;;  %v593_v39 = vpop.f32.mrb[7].mxu1 }
 0x15a   : > { %741 = vst [vmem:[%s1473_s19 + $0x28] sm:$0xff] %v529_v38  ;;  %757 = vst [vmem:[%s1473_s19 + $0xa8] sm:$0xff] %v593_v39 }
 0x15e   : > { %v978_v40 = vpop.f32.mrb[8].mxu0  ;;  %v994_v41 = vpop.f32.mrb[8].mxu1 }
 0x15f   : > { %746 = vst [vmem:[%s1473_s19 + $0x50] sm:$0xff] %v978_v40  ;;  %762 = vst [vmem:[%s1473_s19 + $0xd0] sm:$0xff] %v994_v41  ;;  %v542_v42 = vpop.f32.mrb[9].mxu0  ;;  %v606_v43 = vpop.f32.mrb[9].mxu1 }
 0x160   : > { %744 = vst [vmem:[%s1473_s19 + $0x40] sm:$0xff] %v542_v42  ;;  %760 = vst [vmem:[%s1473_s19 + $0xc0] sm:$0xff] %v606_v43  ;;  %v979_v44 = vpop.f32.mrb[10].mxu0  ;;  %v995_v45 = vpop.f32.mrb[10].mxu1 }
 0x161   : > { %747 = vst [vmem:[%s1473_s19 + $0x58] sm:$0xff] %v979_v44  ;;  %763 = vst [vmem:[%s1473_s19 + $0xd8] sm:$0xff] %v995_v45  ;;  %v545_v46 = vpop.f32.mrb[11].mxu0  ;;  %v609_v47 = vpop.f32.mrb[11].mxu1 }
 0x162   : > { %745 = vst [vmem:[%s1473_s19 + $0x48] sm:$0xff] %v545_v46  ;;  %761 = vst [vmem:[%s1473_s19 + $0xc8] sm:$0xff] %v609_v47 }
 0x166   : > { %v982_v48 = vpop.f32.mrb[12].mxu0  ;;  %v998_v49 = vpop.f32.mrb[12].mxu1 }
 0x167   : > { %750 = vst [vmem:[%s1473_s19 + $0x70] sm:$0xff] %v982_v48  ;;  %766 = vst [vmem:[%s1473_s19 + $0xf0] sm:$0xff] %v998_v49  ;;  %v558_v50 = vpop.f32.mrb[13].mxu0  ;;  %v622_v51 = vpop.f32.mrb[13].mxu1 }
 0x168   : > { %748 = vst [vmem:[%s1473_s19 + $0x60] sm:$0xff] %v558_v50  ;;  %764 = vst [vmem:[%s1473_s19 + $0xe0] sm:$0xff] %v622_v51  ;;  %v983_v52 = vpop.f32.mrb[14].mxu0  ;;  %v999_v53 = vpop.f32.mrb[14].mxu1 }
 0x169   : > { %751 = vst [vmem:[%s1473_s19 + $0x78] sm:$0xff] %v983_v52  ;;  %767 = vst [vmem:[%s1473_s19 + $0xf8] sm:$0xff] %v999_v53  ;;  %v561_v54 = vpop.f32.mrb[15].mxu0  ;;  %v625_v55 = vpop.f32.mrb[15].mxu1 }
 0x16a   : > { %749 = vst [vmem:[%s1473_s19 + $0x68] sm:$0xff] %v561_v54  ;;  %765 = vst [vmem:[%s1473_s19 + $0xe8] sm:$0xff] %v625_v55 }
 0x16b   : > { %1188 = shalt.err (!%p1185_p5)
}
 0x16c   : > { %s1189_s3 = scalar_lea.hbm %s1506_s5, 4096  ;;  %s1193_s27 = scalar_lea.hbm %s1564_s2, 12288 }
 0x16d   : > { %p1190_p9 = scmp.ne.s32.totalorder %s1506_s5, %s1189_s3  ;;  %p1194_p3 = scmp.lt.u32.totalorder %s1506_s5, %s1564_s2 }
 0x16e   : > { %p1195_p7 = scmp.lt.u32.totalorder %s1193_s27, %s1189_s3  ;;  %p1197_p4 = scmp.lt.u32.totalorder %s1189_s3, %s1506_s5 }
 0x16f   : > { %p1191_p1 = pnand %p1190_p9, %p1383_p11 }
 0x170   : > { %p1196_p13 = por %p1195_p7, %p1194_p3 }
 0x171   : > { %p1192_p2 = pneg %p1191_p1 }
 0x172   : > { %p1198_p6 = por %p1197_p4, %p1196_p13 }
 0x174   : > { %p1199_p8 = pnand %p1198_p6, %p1192_p2 }
 0x176   : > { %1202 = shalt.err (!%p1199_p8)
}
 0x177   : > { %s1268_s17 = smov 128   ;;  %s1269_s19 = smov 8  }
 0x178   : > { %1022 = dma.vmem_to_hbm [thread:$0]  (%p1383_p11), %s1508_s6, 4096, %s1506_s5, %s769_s12, %s1268_s17, %s1268_s17, %s1269_s19  }
 0x179 PF: > { %p1039_p12 = scmp.ge.s32.totalorder %s1261_s14, 2  ;;  %s798_s21 = sand.u32 1, %s1241_s9  }
 0x17a   : > { %p1582_p10 = scmp.ne.s32.totalorder %s1572_s20, 0  ;;  %s799_s7 = scalar_lea.sflag [#allocation5], %s798_s21 }
 0x17c   : > { %p1033_p0 = pnand %p1039_p12, %p1582_p10 }
 0x17e   : > { %1236 = dma.done.wait (!%p1033_p0), %s799_s7, 4096  }
 0x17f   : > { %1238 = vsyncadd (!%p1033_p0), %s799_s7, 4294963200  ;;  %s19_s14 = sadd.s32 1, %s1261_s14   ;;  %s1583_s9 = smov %s1245_s10 }
 0x180   : > { %p16_p5 = scmp.ge.s32.totalorder %s19_s14, 5   ;;  %s1584_s10 = smov %s1249_s11 }
 0x181   : > { %s1585_s11 = smov %s1392_s28  ;;  %s1586_s12 = smov %s1257_s13 }
 0x182   : > { %s1587_s13 = smov %s1589_s25  ;;  %18 = sbr.rel (!%p16_p5) target bundleno = 7 (0x7), region = 86 }
 0x189   :  { %804 = vsyncpa [#allocation4], 1 }
 0x18a   :  { %806 = vsyncpa [#allocation4 + $0x1], 1 }
 0x18b   :  { %807 = vsyncpa [#allocation7], 1 }
 0x18c   :  { %808 = vsyncpa [#allocation5], 1 }
 0x18d   :  { %810 = vsyncpa [#allocation5 + $0x1], 1 }

</bundles_post_ra>
